<compile_context>
chip_gen: v7x
topology: tpu7x:2x2x1
jax: 0.10.0
libtpu: 0.0.40
codegen_flags: <defaults>
</compile_context>

<pallas_src>
import functools

import jax
import jax.numpy as jnp
from jax.experimental import pallas as pl
from jax.experimental.pallas import tpu as pltpu


def agent_forward_kernel(x_ref,
                         w1_ref, b1_ref,
                         w2_ref, b2_ref,
                         w3_ref, b3_ref,
                         w4_ref, b4_ref,
                         o_ref):
    """x_ref: [TILE_M, in] bf16; w*: [in, out] bf16; b*: [1, out] f32."""
    h = x_ref[...]
    # Hidden layers: bf16 matmul -> f32 accumulate -> f32 bias + ReLU -> bf16.
    for w_ref, b_ref in ((w1_ref, b1_ref), (w2_ref, b2_ref), (w3_ref, b3_ref)):
        acc = jnp.dot(h, w_ref[...], preferred_element_type=jnp.float32)
        acc = jnp.maximum(acc + b_ref[...], 0.0)
        h = acc.astype(jnp.bfloat16)
    # Output layer (the original module also applies ReLU here).
    acc = jnp.dot(h, w4_ref[...], preferred_element_type=jnp.float32)
    acc = jnp.maximum(acc + b4_ref[...], 0.0)
    o_ref[...] = acc.astype(o_ref.dtype)


@functools.partial(jax.jit, static_argnames=("tile_m",))
def agent_forward(state, params, *, tile_m=256):
    """state: [B, input_dims] f32. params: dict of W [in,out] f32, b [1,out] f32."""
    B, input_dims = state.shape
    n_actions = params["w4"].shape[1]

    # Pad B to a sublane-aligned multiple of the batch tile.
    b_pad = max(8, pl.cdiv(B, 8) * 8)
    tm = min(tile_m, b_pad)
    b_pad = pl.cdiv(b_pad, tm) * tm

    x = state.astype(jnp.bfloat16)
    if b_pad != B:
        x = jnp.pad(x, ((0, b_pad - B), (0, 0)))

    # bf16 matmul operands (halves weight DMA, MXU-native on v6e/v7x);
    # biases remain f32 for the f32 epilogue.
    args = (x,
            params["w1"].astype(jnp.bfloat16), params["b1"],
            params["w2"].astype(jnp.bfloat16), params["b2"],
            params["w3"].astype(jnp.bfloat16), params["b3"],
            params["w4"].astype(jnp.bfloat16), params["b4"])

    # Weights/biases: full blocks, constant index_map -> VMEM-resident across
    # all grid steps. State/output: tiled along the batch dim only.
    resident = lambda a: pl.BlockSpec(a.shape, lambda i: (0,) * a.ndim)
    in_specs = [pl.BlockSpec((tm, input_dims), lambda i: (i, 0))]
    in_specs += [resident(a) for a in args[1:]]
    out_spec = pl.BlockSpec((tm, n_actions), lambda i: (i, 0))

    out = pl.pallas_call(
        agent_forward_kernel,
        out_shape=jax.ShapeDtypeStruct((b_pad, n_actions), jnp.float32),
        grid=(b_pad // tm,),
        in_specs=in_specs,
        out_specs=out_spec,
        compiler_params=pltpu.CompilerParams(
            dimension_semantics=("parallel",)),
    )(*args)
    return out[:B]


def init_params(key, input_dims, fc1_dims, fc2_dims, fc3_dims, n_actions):
    """nn.Linear-style init; weights stored transposed as [in, out], f32."""
    dims = [(input_dims, fc1_dims), (fc1_dims, fc2_dims),
            (fc2_dims, fc3_dims), (fc3_dims, n_actions)]
    params = {}
    for i, (fan_in, fan_out) in enumerate(dims, start=1):
        key, kw, kb = jax.random.split(key, 3)
        bound = 1.0 / jnp.sqrt(fan_in)
        params[f"w{i}"] = jax.random.uniform(
            kw, (fan_in, fan_out), jnp.float32, -bound, bound)
        params[f"b{i}"] = jax.random.uniform(
            kb, (1, fan_out), jnp.float32, -bound, bound)
    return params


def ref_forward_bf16(state, params):
    """Mirrors the kernel numerics (bf16 matmul operands, f32 accumulation)."""
    h = state
    for i in range(1, 5):
        acc = jnp.dot(h.astype(jnp.bfloat16),
                      params[f"w{i}"].astype(jnp.bfloat16),
                      preferred_element_type=jnp.float32)
        h = jnp.maximum(acc + params[f"b{i}"], 0.0)
    return h


def ref_forward_f32(state, params):
    """Module semantics in plain f32 (for a loose sanity check)."""
    h = state
    for i in range(1, 5):
        h = jnp.maximum(h @ params[f"w{i}"] + params[f"b{i}"], 0.0)
    return h


if __name__ == "__main__":
    B = 2
    input_dims, fc1_dims, fc2_dims, fc3_dims, n_actions = 32, 64, 64, 32, 8

    key = jax.random.PRNGKey(0)
    key, kx, kb = jax.random.split(key, 3)
    state = jax.random.normal(kx, (B, input_dims), jnp.float32)
    params = init_params(key, input_dims, fc1_dims, fc2_dims, fc3_dims,
                         n_actions)

    # Small batch (single grid step, padded 2 -> 8 rows).
    out = jax.block_until_ready(agent_forward(state, params))
    assert out.shape == (B, n_actions)
    assert jnp.allclose(out, ref_forward_bf16(state, params),
                        atol=1e-4, rtol=1e-4)
    assert jnp.allclose(out, ref_forward_f32(state, params),
                        atol=2e-2, rtol=2e-2)

    # Larger batch: exercises the multi-step batch grid with VMEM-resident
    # weights (300 -> padded 512, two 256-row tiles).
    big_state = jax.random.normal(kb, (300, input_dims), jnp.float32)
    big_out = jax.block_until_ready(agent_forward(big_state, params))
    assert big_out.shape == (300, n_actions)
    assert jnp.allclose(big_out, ref_forward_bf16(big_state, params),
                        atol=1e-4, rtol=1e-4)

    print("KERNEL_OK")
</pallas_src>

<mosaic_0001>
module attributes {stable_mosaic.version = 11 : i64} {
  func.func @agent_forward_kernel(%arg0: i32, %arg1: memref<8x32xbf16, #tpu.memory_space<vmem>>, %arg2: memref<32x64xbf16, #tpu.memory_space<vmem>>, %arg3: memref<1x64xf32, #tpu.memory_space<vmem>>, %arg4: memref<64x64xbf16, #tpu.memory_space<vmem>>, %arg5: memref<1x64xf32, #tpu.memory_space<vmem>>, %arg6: memref<64x32xbf16, #tpu.memory_space<vmem>>, %arg7: memref<1x32xf32, #tpu.memory_space<vmem>>, %arg8: memref<32x8xbf16, #tpu.memory_space<vmem>>, %arg9: memref<1x8xf32, #tpu.memory_space<vmem>>, %arg10: memref<8x8xf32, #tpu.memory_space<vmem>>) attributes {dimension_semantics = [#tpu.dimension_semantics<parallel>], iteration_bounds = array<i64: 1>, scalar_prefetch = 0 : i64, scratch_operands = 0 : i64, tpu.core_type = #tpu.core_type<tc>, window_params = [{transform_indices = @transform_0, window_bounds = array<i64: 8, 32>}, {pipeline_mode = #tpu.pipeline_mode<synchronous>, transform_indices = @transform_1, window_bounds = array<i64: 32, 64>}, {pipeline_mode = #tpu.pipeline_mode<synchronous>, transform_indices = @transform_2, window_bounds = array<i64: 1, 64>}, {pipeline_mode = #tpu.pipeline_mode<synchronous>, transform_indices = @transform_3, window_bounds = array<i64: 64, 64>}, {pipeline_mode = #tpu.pipeline_mode<synchronous>, transform_indices = @transform_4, window_bounds = array<i64: 1, 64>}, {pipeline_mode = #tpu.pipeline_mode<synchronous>, transform_indices = @transform_5, window_bounds = array<i64: 64, 32>}, {pipeline_mode = #tpu.pipeline_mode<synchronous>, transform_indices = @transform_6, window_bounds = array<i64: 1, 32>}, {pipeline_mode = #tpu.pipeline_mode<synchronous>, transform_indices = @transform_7, window_bounds = array<i64: 32, 8>}, {pipeline_mode = #tpu.pipeline_mode<synchronous>, transform_indices = @transform_8, window_bounds = array<i64: 1, 8>}, {transform_indices = @transform_9, window_bounds = array<i64: 8, 8>}]} {
    %c0 = arith.constant 0 : index
    %c0_0 = arith.constant 0 : index
    %0 = vector.load %arg1[%c0, %c0_0] : memref<8x32xbf16, #tpu.memory_space<vmem>>, vector<8x32xbf16>
    %c0_1 = arith.constant 0 : index
    %c0_2 = arith.constant 0 : index
    %1 = vector.load %arg2[%c0_1, %c0_2] : memref<32x64xbf16, #tpu.memory_space<vmem>>, vector<32x64xbf16>
    %cst = arith.constant dense<0.000000e+00> : vector<8x64xf32>
    %2 = tpu.matmul %0, %1, %cst {dimension_numbers = #tpu.dot_dimension_numbers<[1], [0], [0], [1], [0, 0, 1, 1], [], []>} : vector<8x32xbf16>, vector<32x64xbf16>, vector<8x64xf32> -> vector<8x64xf32>
    %c0_3 = arith.constant 0 : index
    %c0_4 = arith.constant 0 : index
    %3 = vector.load %arg3[%c0_3, %c0_4] : memref<1x64xf32, #tpu.memory_space<vmem>>, vector<1x64xf32>
    %4 = vector.broadcast %3 : vector<1x64xf32> to vector<8x64xf32>
    %5 = arith.addf %2, %4 : vector<8x64xf32>
    %cst_5 = arith.constant 0.000000e+00 : f32
    %6 = vector.broadcast %cst_5 : f32 to vector<8x64xf32>
    %7 = arith.maximumf %5, %6 : vector<8x64xf32>
    %8 = arith.truncf %7 : vector<8x64xf32> to vector<8x64xbf16>
    %c0_6 = arith.constant 0 : index
    %c0_7 = arith.constant 0 : index
    %9 = vector.load %arg4[%c0_6, %c0_7] : memref<64x64xbf16, #tpu.memory_space<vmem>>, vector<64x64xbf16>
    %cst_8 = arith.constant dense<0.000000e+00> : vector<8x64xf32>
    %10 = tpu.matmul %8, %9, %cst_8 {dimension_numbers = #tpu.dot_dimension_numbers<[1], [0], [0], [1], [0, 0, 1, 1], [], []>} : vector<8x64xbf16>, vector<64x64xbf16>, vector<8x64xf32> -> vector<8x64xf32>
    %c0_9 = arith.constant 0 : index
    %c0_10 = arith.constant 0 : index
    %11 = vector.load %arg5[%c0_9, %c0_10] : memref<1x64xf32, #tpu.memory_space<vmem>>, vector<1x64xf32>
    %12 = vector.broadcast %11 : vector<1x64xf32> to vector<8x64xf32>
    %13 = arith.addf %10, %12 : vector<8x64xf32>
    %cst_11 = arith.constant 0.000000e+00 : f32
    %14 = vector.broadcast %cst_11 : f32 to vector<8x64xf32>
    %15 = arith.maximumf %13, %14 : vector<8x64xf32>
    %16 = arith.truncf %15 : vector<8x64xf32> to vector<8x64xbf16>
    %c0_12 = arith.constant 0 : index
    %c0_13 = arith.constant 0 : index
    %17 = vector.load %arg6[%c0_12, %c0_13] : memref<64x32xbf16, #tpu.memory_space<vmem>>, vector<64x32xbf16>
    %cst_14 = arith.constant dense<0.000000e+00> : vector<8x32xf32>
    %18 = tpu.matmul %16, %17, %cst_14 {dimension_numbers = #tpu.dot_dimension_numbers<[1], [0], [0], [1], [0, 0, 1, 1], [], []>} : vector<8x64xbf16>, vector<64x32xbf16>, vector<8x32xf32> -> vector<8x32xf32>
    %c0_15 = arith.constant 0 : index
    %c0_16 = arith.constant 0 : index
    %19 = vector.load %arg7[%c0_15, %c0_16] : memref<1x32xf32, #tpu.memory_space<vmem>>, vector<1x32xf32>
    %20 = vector.broadcast %19 : vector<1x32xf32> to vector<8x32xf32>
    %21 = arith.addf %18, %20 : vector<8x32xf32>
    %cst_17 = arith.constant 0.000000e+00 : f32
    %22 = vector.broadcast %cst_17 : f32 to vector<8x32xf32>
    %23 = arith.maximumf %21, %22 : vector<8x32xf32>
    %24 = arith.truncf %23 : vector<8x32xf32> to vector<8x32xbf16>
    %c0_18 = arith.constant 0 : index
    %c0_19 = arith.constant 0 : index
    %25 = vector.load %arg8[%c0_18, %c0_19] : memref<32x8xbf16, #tpu.memory_space<vmem>>, vector<32x8xbf16>
    %cst_20 = arith.constant dense<0.000000e+00> : vector<8x8xf32>
    %26 = tpu.matmul %24, %25, %cst_20 {dimension_numbers = #tpu.dot_dimension_numbers<[1], [0], [0], [1], [0, 0, 1, 1], [], []>} : vector<8x32xbf16>, vector<32x8xbf16>, vector<8x8xf32> -> vector<8x8xf32>
    %c0_21 = arith.constant 0 : index
    %c0_22 = arith.constant 0 : index
    %27 = vector.load %arg9[%c0_21, %c0_22] : memref<1x8xf32, #tpu.memory_space<vmem>>, vector<1x8xf32>
    %28 = vector.broadcast %27 : vector<1x8xf32> to vector<8x8xf32>
    %29 = arith.addf %26, %28 : vector<8x8xf32>
    %cst_23 = arith.constant 0.000000e+00 : f32
    %30 = vector.broadcast %cst_23 : f32 to vector<8x8xf32>
    %31 = arith.maximumf %29, %30 : vector<8x8xf32>
    %c0_24 = arith.constant 0 : index
    %c0_25 = arith.constant 0 : index
    %32 = vector.load %arg10[%c0_24, %c0_25] : memref<8x8xf32, #tpu.memory_space<vmem>>, vector<8x8xf32>
    tpu.vector_store %arg10[%c0_24, %c0_25], %31 {strides = array<i32>} : memref<8x8xf32, #tpu.memory_space<vmem>>, vector<8x8xf32>,
    return
  }
  func.func @transform_0(%arg0: i32) -> (i32, i32) {
    %c0_i32 = arith.constant 0 : i32
    %c0_i32_0 = arith.constant 0 : i32
    return %arg0, %c0_i32 : i32, i32
  }
  func.func @transform_1(%arg0: i32) -> (i32, i32) {
    %c0_i32 = arith.constant 0 : i32
    %c0_i32_0 = arith.constant 0 : i32
    %c0_i32_1 = arith.constant 0 : i32
    return %c0_i32, %c0_i32_0 : i32, i32
  }
  func.func @transform_2(%arg0: i32) -> (i32, i32) {
    %c0_i32 = arith.constant 0 : i32
    %c0_i32_0 = arith.constant 0 : i32
    %c0_i32_1 = arith.constant 0 : i32
    return %c0_i32, %c0_i32_0 : i32, i32
  }
  func.func @transform_3(%arg0: i32) -> (i32, i32) {
    %c0_i32 = arith.constant 0 : i32
    %c0_i32_0 = arith.constant 0 : i32
    %c0_i32_1 = arith.constant 0 : i32
    return %c0_i32, %c0_i32_0 : i32, i32
  }
  func.func @transform_4(%arg0: i32) -> (i32, i32) {
    %c0_i32 = arith.constant 0 : i32
    %c0_i32_0 = arith.constant 0 : i32
    %c0_i32_1 = arith.constant 0 : i32
    return %c0_i32, %c0_i32_0 : i32, i32
  }
  func.func @transform_5(%arg0: i32) -> (i32, i32) {
    %c0_i32 = arith.constant 0 : i32
    %c0_i32_0 = arith.constant 0 : i32
    %c0_i32_1 = arith.constant 0 : i32
    return %c0_i32, %c0_i32_0 : i32, i32
  }
  func.func @transform_6(%arg0: i32) -> (i32, i32) {
    %c0_i32 = arith.constant 0 : i32
    %c0_i32_0 = arith.constant 0 : i32
    %c0_i32_1 = arith.constant 0 : i32
    return %c0_i32, %c0_i32_0 : i32, i32
  }
  func.func @transform_7(%arg0: i32) -> (i32, i32) {
    %c0_i32 = arith.constant 0 : i32
    %c0_i32_0 = arith.constant 0 : i32
    %c0_i32_1 = arith.constant 0 : i32
    return %c0_i32, %c0_i32_0 : i32, i32
  }
  func.func @transform_8(%arg0: i32) -> (i32, i32) {
    %c0_i32 = arith.constant 0 : i32
    %c0_i32_0 = arith.constant 0 : i32
    %c0_i32_1 = arith.constant 0 : i32
    return %c0_i32, %c0_i32_0 : i32, i32
  }
  func.func @transform_9(%arg0: i32) -> (i32, i32) {
    %c0_i32 = arith.constant 0 : i32
    %c0_i32_0 = arith.constant 0 : i32
    return %arg0, %c0_i32 : i32, i32
  }
}

</mosaic_0001>

<bundles_post_ra>
// kernel: agent_forward.1
= control target key start
LH: loop header
LB: loop body
LE: loop exit
PB: predicated region body
PF: predicated region fallthrough
CT: control target
= control target key end

     0   :  { %v435_v0 = vmov 0.0   ;;  %vm436_vm0 = vmmov 0   ;;  %vm57_vm1 = vcmask 261120   ;;  %vm142_vm2 = vcmask 523264   ;;  %s549_s1 = inlined_call_operand.vmem [shape: bf16[32,64], index: 1, kind: input, shape index: {}]   ;;  %s550_s3 = inlined_call_operand.vmem [shape: bf16[64,64], index: 3, kind: input, shape index: {}]   ;;  %s551_s0 = inlined_call_operand.vmem [shape: bf16[8,32], index: 0, kind: input, shape index: {}]   ;;  %s552_s5 = inlined_call_operand.vmem [shape: bf16[64,32], index: 5, kind: input, shape index: {}]   ;;  %s553_s2 = inlined_call_operand.vmem [shape: f32[1,64], index: 2, kind: input, shape index: {}]   ;;  %s554_s7 = inlined_call_operand.vmem [shape: bf16[32,8], index: 7, kind: input, shape index: {}]   ;;  %s555_s4 = inlined_call_operand.vmem [shape: f32[1,64], index: 4, kind: input, shape index: {}]   ;;  %s556_s6 = inlined_call_operand.vmem [shape: f32[1,32], index: 6, kind: input, shape index: {}]   ;;  %s557_s8 = inlined_call_operand.vmem [shape: f32[1,8], index: 8, kind: input, shape index: {}]   ;;  %s558_s9 = inlined_call_operand.vmem [shape: f32[8,8], index: 9, kind: output, shape index: {}]  }
   0x1   :  { %381 = vmatprep.subr.bf16.mxu0 %v435_v0  ;;  %v423_v1 = vld [vmem:[%s549_s1] sm:$0xff]   ;;  %385 = vmatprep.mubr.msk.bf16.mxu0 %vm436_vm0, %v435_v0  ;;  %v424_v2 = vld [vmem:[%s549_s1 + $0x8] sm:$0xff]   ;;  %v427_v6 = vld [vmem:[%s550_s3 + $0x10] sm:$0xff]   ;;  %vm339_vm3 = vcmask 64512  }
   0x2   :  { %389 = vmatprep.subr.bf16.mxu1 %v435_v0  ;;  %397 = vmatprep.mubr.msk.bf16.mxu1 %vm436_vm0, %v435_v0  ;;  %v425_v3 = vld [vmem:[%s550_s3] sm:$0xff]   ;;  %v426_v4 = vld [vmem:[%s550_s3 + $0x8] sm:$0xff]   ;;  %v428_v7 = vld [vmem:[%s550_s3 + $0x18] sm:$0xff]  }
   0x3   :  { %382 = vmatpush3.bf16.msra.mxu0 %v423_v1  ;;  %390 = vmatpush3.bf16.msra.mxu1 %v425_v3  ;;  %v33_v5 = vld [vmem:[%s551_s0] sm:$0xf]  ;;  %v430_v9 = vld [vmem:[%s552_s5 + $0x8] sm:$0xff]   ;;  %v431_v18 = vld [vmem:[%s552_s5 + $0x10] sm:$0xff]  }
   0x4   :  { %383 = vmatprep.subr.bf16.mxu0 %v435_v0  ;;  %391 = vmatprep.subr.bf16.mxu1 %v435_v0  ;;  %v429_v8 = vld [vmem:[%s552_s5] sm:$0xff]   ;;  %v432_v19 = vld [vmem:[%s552_s5 + $0x18] sm:$0xff]   ;;  %v434_v29 = vld [vmem:[%s554_s7 + $0x8] sm:$0xff]  }
   0x5   :  { %v345_v10 = vld [vmem:[%s553_s2] ss:$0 sm:$0xff] }
   0x6   :  { %v433_v20 = vld [vmem:[%s554_s7] sm:$0xff]  }
   0x7   :  { %384 = vmatpush3.bf16.msra.mxu0 %v424_v2  ;;  %392 = vmatpush3.bf16.msra.mxu1 %v426_v4  ;;  %v349_v21 = vld [vmem:[%s555_s4] ss:$0 sm:$0xff] }
   0x8   :  { %401 = vmatprep.subr.bf16.mxu0 %v435_v0  ;;  %393 = vmatprep.subr.bf16.mxu1 %v435_v0  ;;  %v355_v30 = vld [vmem:[%s556_s6] ss:$0 sm:$0xff] }
   0x9   :  { %v361_v38 = vld [vmem:[%s557_s8] ss:$0 sm:$0xff] }
   0xa   :  { %386 = vmatmul.mubr.msk.bf16.vlgmr.msra.gmra.mrb[0].mxu0 %vm57_vm1, %v33_v5 }
   0xb   :  { %409 = vmatprep.mubr.msk.bf16.mxu0 %vm436_vm0, %v435_v0  ;;  %394 = vmatpush3.bf16.msra.mxu1 %v427_v6 }
   0xc   :  { %395 = vmatprep.subr.bf16.mxu1 %v435_v0  ;;  %402 = vmatpush3.bf16.msra.mxu0 %v429_v8 }
   0xd   :  { %403 = vmatprep.subr.bf16.mxu0 %v435_v0 }
   0xf   :  { %396 = vmatpush3.bf16.msra.mxu1 %v428_v7 }
  0x10   :  { %413 = vmatprep.subr.bf16.mxu1 %v435_v0  ;;  %404 = vmatpush3.bf16.msra.mxu0 %v430_v9 }
  0x11   :  { %405 = vmatprep.subr.bf16.mxu0 %v435_v0 }
  0x14   :  { %406 = vmatpush3.bf16.msra.mxu0 %v431_v18 }
  0x15   :  { %407 = vmatprep.subr.bf16.mxu0 %v435_v0 }
  0x18   :  { %408 = vmatpush3.bf16.msra.mxu0 %v432_v19 }
  0xdd   :  { %v95_v11 = vpop.f32.mrb[0].mxu0 }
  0xde   :  { %v96_v12 = vadd.f32 %v345_v10, %v95_v11  ;;  %v387_v13 = vpop.f32.mrb[1].mxu0 }
  0xdf   :  { %v98_v14 = vpop.f32.mrb[2].mxu0 }
  0xe0   :  { %v101_v15 = vmax.f32 %v96_v12, 0.0  ;;  %v388_v16 = vpop.f32.mrb[3].mxu0 }
  0xe2   :  { %v102_v17 = vpack.c.bf16 %v101_v15, %v101_v15 }
  0xe4   :  { %398 = vmatmul.mubr.msk.bf16.vlgmr.msra.gmra.mrb[0].mxu1 %vm142_vm2, %v102_v17 }
  0xe5   :  { %417 = vmatprep.mubr.msk.bf16.mxu1 %vm436_vm0, %v435_v0  ;;  %414 = vmatpush3.bf16.msra.mxu1 %v433_v20 }
  0xe6   :  { %415 = vmatprep.subr.bf16.mxu1 %v435_v0 }
  0xe9   :  { %416 = vmatpush3.bf16.msra.mxu1 %v434_v29 }
 0x1b7   :  { %v180_v22 = vpop.f32.mrb[0].mxu1 }
 0x1b8   :  { %v181_v23 = vadd.f32 %v349_v21, %v180_v22  ;;  %v399_v24 = vpop.f32.mrb[1].mxu1 }
 0x1b9   :  { %v183_v25 = vpop.f32.mrb[2].mxu1 }
 0x1ba   :  { %v186_v26 = vmax.f32 %v181_v23, 0.0  ;;  %v400_v27 = vpop.f32.mrb[3].mxu1 }
 0x1bc   :  { %v187_v28 = vpack.c.bf16 %v186_v26, %v186_v26 }
 0x1be   :  { %410 = vmatmul.mubr.msk.bf16.vlgmr.msra.gmra.mrb[4].mxu0 %vm142_vm2, %v187_v28 }
 0x291   :  { %v264_v31 = vpop.f32.mrb[4].mxu0 }
 0x292   :  { %v265_v32 = vadd.f32 %v355_v30, %v264_v31  ;;  %v411_v33 = vpop.f32.mrb[5].mxu0 }
 0x293   :  { %v267_v34 = vpop.f32.mrb[6].mxu0 }
 0x294   :  { %v270_v35 = vmax.f32 %v265_v32, 0.0  ;;  %v412_v36 = vpop.f32.mrb[7].mxu0 }
 0x296   :  { %v271_v37 = vpack.c.bf16 %v270_v35, %v270_v35 }
 0x298   :  { %418 = vmatmul.mubr.msk.bf16.vlgmr.msra.gmra.mrb[4].mxu1 %vm57_vm1, %v271_v37 }
 0x36b   :  { %v332_v39 = vpop.f32.mrb[4].mxu1 }
 0x36c   :  { %v333_v40 = vadd.f32 %v361_v38, %v332_v39  ;;  %v419_v41 = vpop.f32.mrb[5].mxu1 }
 0x36d   :  { %v335_v42 = vpop.f32.mrb[6].mxu1 }
 0x36e   :  { %v338_v43 = vmax.f32 %v333_v40, 0.0  ;;  %v420_v44 = vpop.f32.mrb[7].mxu1 }
 0x370   :  { %340 = vst.msk [vmem:[%s558_s9] sm:$0xff] %vm339_vm3, %v338_v43 }

</bundles_post_ra>
